<compile_context>
chip_gen: v5e
topology: v5e:2x2
jax: 0.10.0
libtpu: 0.0.40
codegen_flags: <defaults>
</compile_context>

<pallas_src>
import functools

import jax
import jax.numpy as jnp
from jax import lax
from jax.experimental import pallas as pl
from jax.experimental.pallas import tpu as pltpu

_LN_EPS = 1e-5   # torch.nn.LayerNorm default
_LANE = 128
_TM_CAP = 1024


def _round_up(n, m):
    return (n + m - 1) // m * m


def _pick_tm(B):
    """Even number of batch tiles (v7x has 2 TCs), each capped at _TM_CAP."""
    b = max(int(B), 1)
    n_tiles = 2 * pl.cdiv(b, 2 * _TM_CAP)
    return min(_TM_CAP, max(16, _round_up(pl.cdiv(b, n_tiles), 16)))


def _ln_relu(h, gamma, beta, valid):
    """LayerNorm (+affine) + ReLU over the first `valid` lanes of h.

    Padded lanes of h are exactly zero on entry (zero-padded weight columns
    and bias lanes), so full-lane sums equal valid-lane sums and the moments
    form of the variance is exact.  Padded gamma/beta lanes are zero, so the
    padded lanes come out exactly zero again after the affine + ReLU.
    """
    inv = 1.0 / float(valid)
    mean = jnp.sum(h, axis=-1, keepdims=True) * inv
    ex2 = jnp.sum(h * h, axis=-1, keepdims=True) * inv
    var = jnp.maximum(ex2 - mean * mean, 0.0)     # guard f32 cancellation
    hn = (h - mean) * lax.rsqrt(var + _LN_EPS)
    return jnp.maximum(hn * gamma + beta, 0.0)


def _mlp_kernel(x_ref,
                w1_ref, b1_ref, g1_ref, be1_ref,
                w2_ref, b2_ref, g2_ref, be2_ref,
                w3_ref, b3_ref,
                o_ref, *, h1_valid, h2_valid):
    # Layer 1: Linear (bf16 MXU operands, f32 acc) -> LayerNorm -> ReLU (f32)
    h1 = jnp.dot(x_ref[...], w1_ref[...],
                 preferred_element_type=jnp.float32) + b1_ref[...]
    h1 = _ln_relu(h1, g1_ref[...], be1_ref[...], h1_valid)

    # Layer 2
    h2 = jnp.dot(h1.astype(jnp.bfloat16), w2_ref[...],
                 preferred_element_type=jnp.float32) + b2_ref[...]
    h2 = _ln_relu(h2, g2_ref[...], be2_ref[...], h2_valid)

    # Final projection (lane-dense 128-wide output tile, stored as bf16)
    y = jnp.dot(h2.astype(jnp.bfloat16), w3_ref[...],
                preferred_element_type=jnp.float32) + b3_ref[...]
    o_ref[...] = y.astype(o_ref.dtype)


def _init_params(key, in_dim, out_dim):
    """Deterministic synthetic init (PyTorch-Linear-style uniform bounds).

    Weights are stored pre-transposed as [in_features, out_features]."""
    h1 = max(in_dim // 2, 1)
    h2 = max(h1 // 2, 1)
    dims = [(in_dim, h1), (h1, h2), (h2, out_dim)]
    ks = jax.random.split(key, 6)
    params = {}
    for i, (din, dout) in enumerate(dims, start=1):
        bound = 1.0 / jnp.sqrt(din)
        params[f"w{i}"] = jax.random.uniform(
            ks[2 * (i - 1)], (din, dout), jnp.float32, -bound, bound)
        params[f"b{i}"] = jax.random.uniform(
            ks[2 * (i - 1) + 1], (1, dout), jnp.float32, -bound, bound)
    # LayerNorm affine params (torch default: weight=1, bias=0)
    params["g1"] = jnp.ones((1, h1), jnp.float32)
    params["be1"] = jnp.zeros((1, h1), jnp.float32)
    params["g2"] = jnp.ones((1, h2), jnp.float32)
    params["be2"] = jnp.zeros((1, h2), jnp.float32)
    return params


def prepare_params(params):
    """Zero-pad hidden/output feature dims to 128 lanes; cast weights to bf16.

    The input lane dim (W1 rows) is deliberately left unpadded -- the x
    BlockSpec uses the full array dim, which is legal and avoids streaming
    zero lanes from HBM.  Padded W/b/gamma/beta lanes are exactly zero so the
    padded-lane-zero invariant used by the LayerNorm holds.
    """
    in_dim, h1 = params["w1"].shape
    h2 = params["w2"].shape[1]
    out_dim = params["w3"].shape[1]
    ph1, ph2, pout = (_round_up(d, _LANE) for d in (h1, h2, out_dim))

    def pad(a, rows, cols, dtype):
        buf = jnp.zeros((rows, cols), dtype)
        return buf.at[:a.shape[0], :a.shape[1]].set(a.astype(dtype))

    return {
        "w1": pad(params["w1"], in_dim, ph1, jnp.bfloat16),
        "b1": pad(params["b1"], 1, ph1, jnp.float32),
        "g1": pad(params["g1"], 1, ph1, jnp.float32),
        "be1": pad(params["be1"], 1, ph1, jnp.float32),
        "w2": pad(params["w2"], ph1, ph2, jnp.bfloat16),
        "b2": pad(params["b2"], 1, ph2, jnp.float32),
        "g2": pad(params["g2"], 1, ph2, jnp.float32),
        "be2": pad(params["be2"], 1, ph2, jnp.float32),
        "w3": pad(params["w3"], ph2, pout, jnp.bfloat16),
        "b3": pad(params["b3"], 1, pout, jnp.float32),
        "dims": (in_dim, h1, h2, out_dim),
    }


def mlp_forward(x, prepared, *, tm=None):
    """x: [B, in_dim].  prepared: output of prepare_params."""
    in_dim, h1_valid, h2_valid, out_dim = prepared["dims"]
    B = x.shape[0]
    pout = prepared["w3"].shape[1]

    if tm is None:
        tm = _pick_tm(B)
    tm = _round_up(max(tm, 8), 8)
    bp = _round_up(max(B, 1), tm)

    # Stream x as bf16 (halves input HBM bytes + drops the in-kernel cast).
    # Only the batch remainder is padded; no feature-lane padding pass.
    x_bf = x.astype(jnp.bfloat16)
    if bp != B:
        x_bf = jnp.pad(x_bf, ((0, bp - B), (0, 0)))

    args = (x_bf,
            prepared["w1"], prepared["b1"], prepared["g1"], prepared["be1"],
            prepared["w2"], prepared["b2"], prepared["g2"], prepared["be2"],
            prepared["w3"], prepared["b3"])

    def resident(a):
        nd = a.ndim
        return pl.BlockSpec(a.shape, lambda i, _nd=nd: (0,) * _nd)

    kernel = functools.partial(_mlp_kernel, h1_valid=h1_valid, h2_valid=h2_valid)

    out_pad = pl.pallas_call(
        kernel,
        out_shape=jax.ShapeDtypeStruct((bp, pout), jnp.bfloat16),
        grid_spec=pltpu.PrefetchScalarGridSpec(
            num_scalar_prefetch=0,
            grid=(bp // tm,),
            # x block: last dim equals the full array dim (legal, unpadded).
            in_specs=[pl.BlockSpec((tm, in_dim), lambda i: (i, 0))]
                     + [resident(a) for a in args[1:]],
            out_specs=pl.BlockSpec((tm, pout), lambda i: (i, 0)),
        ),
        compiler_params=pltpu.CompilerParams(
            dimension_semantics=("parallel",),          # shards across v7x TCs
            vmem_limit_bytes=32 * 1024 * 1024),         # safe up to tm=1024+
    )(*args)

    # Lane-dense bf16 kernel output; slice valid rows/cols and upcast here.
    return out_pad[:B, :out_dim].astype(x.dtype)


def _reference(x, p):
    """Pure f32 JAX reference (matches the PyTorch forward)."""
    def ln(h):
        m = h.mean(-1, keepdims=True)
        v = ((h - m) ** 2).mean(-1, keepdims=True)
        return (h - m) / jnp.sqrt(v + _LN_EPS)

    h1 = jnp.maximum(ln(x @ p["w1"] + p["b1"]) * p["g1"] + p["be1"], 0.0)
    h2 = jnp.maximum(ln(h1 @ p["w2"] + p["b2"]) * p["g2"] + p["be2"], 0.0)
    return h2 @ p["w3"] + p["b3"]


if __name__ == "__main__":
    key = jax.random.PRNGKey(0)
    k_x, k_p = jax.random.split(key)

    # Small demo shapes: B=32 with tm=16 exercises a 2-step pipelined grid
    # (tm a multiple of 16 for clean bf16 sublane packing).
    B, in_dim, out_dim = 32, 64, 6
    x = jax.random.normal(k_x, (B, in_dim), jnp.float32)
    params = _init_params(k_p, in_dim, out_dim)
    prepared = prepare_params(params)

    out = mlp_forward(x, prepared, tm=16)
    jax.block_until_ready(out)

    ref = _reference(x, params)
    assert out.shape == (B, out_dim)
    # bf16 MXU operands + bf16 output store -> loosened tolerance vs pure-f32.
    assert jnp.allclose(out, ref, atol=5e-2, rtol=5e-2), (
        f"max abs diff {float(jnp.max(jnp.abs(out - ref)))}")

    print("KERNEL_OK")
</pallas_src>

<mosaic_0001>
module attributes {stable_mosaic.version = 11 : i64} {
  func.func @_mlp_kernel(%arg0: i32, %arg1: memref<16x64xbf16, #tpu.memory_space<vmem>>, %arg2: memref<64x128xbf16, #tpu.memory_space<vmem>>, %arg3: memref<1x128xf32, #tpu.memory_space<vmem>>, %arg4: memref<1x128xf32, #tpu.memory_space<vmem>>, %arg5: memref<1x128xf32, #tpu.memory_space<vmem>>, %arg6: memref<128x128xbf16, #tpu.memory_space<vmem>>, %arg7: memref<1x128xf32, #tpu.memory_space<vmem>>, %arg8: memref<1x128xf32, #tpu.memory_space<vmem>>, %arg9: memref<1x128xf32, #tpu.memory_space<vmem>>, %arg10: memref<128x128xbf16, #tpu.memory_space<vmem>>, %arg11: memref<1x128xf32, #tpu.memory_space<vmem>>, %arg12: memref<16x128xbf16, #tpu.memory_space<vmem>>) attributes {dimension_semantics = [#tpu.dimension_semantics<parallel>], iteration_bounds = array<i64: 2>, scalar_prefetch = 0 : i64, scratch_operands = 0 : i64, tpu.core_type = #tpu.core_type<tc>, window_params = [{transform_indices = @transform_0, window_bounds = array<i64: 16, 64>}, {pipeline_mode = #tpu.pipeline_mode<synchronous>, transform_indices = @transform_1, window_bounds = array<i64: 64, 128>}, {pipeline_mode = #tpu.pipeline_mode<synchronous>, transform_indices = @transform_2, window_bounds = array<i64: 1, 128>}, {pipeline_mode = #tpu.pipeline_mode<synchronous>, transform_indices = @transform_3, window_bounds = array<i64: 1, 128>}, {pipeline_mode = #tpu.pipeline_mode<synchronous>, transform_indices = @transform_4, window_bounds = array<i64: 1, 128>}, {pipeline_mode = #tpu.pipeline_mode<synchronous>, transform_indices = @transform_5, window_bounds = array<i64: 128, 128>}, {pipeline_mode = #tpu.pipeline_mode<synchronous>, transform_indices = @transform_6, window_bounds = array<i64: 1, 128>}, {pipeline_mode = #tpu.pipeline_mode<synchronous>, transform_indices = @transform_7, window_bounds = array<i64: 1, 128>}, {pipeline_mode = #tpu.pipeline_mode<synchronous>, transform_indices = @transform_8, window_bounds = array<i64: 1, 128>}, {pipeline_mode = #tpu.pipeline_mode<synchronous>, transform_indices = @transform_9, window_bounds = array<i64: 128, 128>}, {pipeline_mode = #tpu.pipeline_mode<synchronous>, transform_indices = @transform_10, window_bounds = array<i64: 1, 128>}, {transform_indices = @transform_11, window_bounds = array<i64: 16, 128>}]} {
    %c0 = arith.constant 0 : index
    %c0_0 = arith.constant 0 : index
    %0 = vector.load %arg1[%c0, %c0_0] : memref<16x64xbf16, #tpu.memory_space<vmem>>, vector<16x64xbf16>
    %c0_1 = arith.constant 0 : index
    %c0_2 = arith.constant 0 : index
    %1 = vector.load %arg2[%c0_1, %c0_2] : memref<64x128xbf16, #tpu.memory_space<vmem>>, vector<64x128xbf16>
    %cst = arith.constant dense<0.000000e+00> : vector<16x128xf32>
    %2 = tpu.matmul %0, %1, %cst {dimension_numbers = #tpu.dot_dimension_numbers<[1], [0], [0], [1], [0, 0, 1, 1], [], []>} : vector<16x64xbf16>, vector<64x128xbf16>, vector<16x128xf32> -> vector<16x128xf32>
    %c0_3 = arith.constant 0 : index
    %c0_4 = arith.constant 0 : index
    %3 = vector.load %arg3[%c0_3, %c0_4] : memref<1x128xf32, #tpu.memory_space<vmem>>, vector<1x128xf32>
    %4 = vector.broadcast %3 : vector<1x128xf32> to vector<16x128xf32>
    %5 = arith.addf %2, %4 : vector<16x128xf32>
    %c0_5 = arith.constant 0 : index
    %c0_6 = arith.constant 0 : index
    %6 = vector.load %arg4[%c0_5, %c0_6] : memref<1x128xf32, #tpu.memory_space<vmem>>, vector<1x128xf32>
    %c0_7 = arith.constant 0 : index
    %c0_8 = arith.constant 0 : index
    %7 = vector.load %arg5[%c0_7, %c0_8] : memref<1x128xf32, #tpu.memory_space<vmem>>, vector<1x128xf32>
    %cst_9 = arith.constant dense<0.000000e+00> : vector<16xf32>
    %8 = vector.multi_reduction <add>, %5, %cst_9 [1] : vector<16x128xf32> to vector<16xf32>
    %9 = vector.shape_cast %8 : vector<16xf32> to vector<16x1xf32>
    %cst_10 = arith.constant 3.125000e-02 : f32
    %10 = vector.broadcast %cst_10 : f32 to vector<16x1xf32>
    %11 = arith.mulf %9, %10 : vector<16x1xf32>
    %12 = arith.mulf %5, %5 : vector<16x128xf32>
    %cst_11 = arith.constant dense<0.000000e+00> : vector<16xf32>
    %13 = vector.multi_reduction <add>, %12, %cst_11 [1] : vector<16x128xf32> to vector<16xf32>
    %14 = vector.shape_cast %13 : vector<16xf32> to vector<16x1xf32>
    %cst_12 = arith.constant 3.125000e-02 : f32
    %15 = vector.broadcast %cst_12 : f32 to vector<16x1xf32>
    %16 = arith.mulf %14, %15 : vector<16x1xf32>
    %17 = arith.mulf %11, %11 : vector<16x1xf32>
    %18 = arith.subf %16, %17 : vector<16x1xf32>
    %cst_13 = arith.constant 0.000000e+00 : f32
    %19 = vector.broadcast %cst_13 : f32 to vector<16x1xf32>
    %20 = arith.maximumf %18, %19 : vector<16x1xf32>
    %21 = vector.broadcast %11 : vector<16x1xf32> to vector<16x128xf32>
    %22 = arith.subf %5, %21 : vector<16x128xf32>
    %cst_14 = arith.constant 9.99999974E-6 : f32
    %23 = vector.broadcast %cst_14 : f32 to vector<16x1xf32>
    %24 = arith.addf %20, %23 : vector<16x1xf32>
    %25 = math.rsqrt %24 : vector<16x1xf32>
    %26 = vector.broadcast %25 : vector<16x1xf32> to vector<16x128xf32>
    %27 = arith.mulf %22, %26 : vector<16x128xf32>
    %28 = vector.broadcast %6 : vector<1x128xf32> to vector<16x128xf32>
    %29 = arith.mulf %27, %28 : vector<16x128xf32>
    %30 = vector.broadcast %7 : vector<1x128xf32> to vector<16x128xf32>
    %31 = arith.addf %29, %30 : vector<16x128xf32>
    %cst_15 = arith.constant 0.000000e+00 : f32
    %32 = vector.broadcast %cst_15 : f32 to vector<16x128xf32>
    %33 = arith.maximumf %31, %32 : vector<16x128xf32>
    %34 = arith.truncf %33 : vector<16x128xf32> to vector<16x128xbf16>
    %c0_16 = arith.constant 0 : index
    %c0_17 = arith.constant 0 : index
    %35 = vector.load %arg6[%c0_16, %c0_17] : memref<128x128xbf16, #tpu.memory_space<vmem>>, vector<128x128xbf16>
    %cst_18 = arith.constant dense<0.000000e+00> : vector<16x128xf32>
    %36 = tpu.matmul %34, %35, %cst_18 {dimension_numbers = #tpu.dot_dimension_numbers<[1], [0], [0], [1], [0, 0, 1, 1], [], []>} : vector<16x128xbf16>, vector<128x128xbf16>, vector<16x128xf32> -> vector<16x128xf32>
    %c0_19 = arith.constant 0 : index
    %c0_20 = arith.constant 0 : index
    %37 = vector.load %arg7[%c0_19, %c0_20] : memref<1x128xf32, #tpu.memory_space<vmem>>, vector<1x128xf32>
    %38 = vector.broadcast %37 : vector<1x128xf32> to vector<16x128xf32>
    %39 = arith.addf %36, %38 : vector<16x128xf32>
    %c0_21 = arith.constant 0 : index
    %c0_22 = arith.constant 0 : index
    %40 = vector.load %arg8[%c0_21, %c0_22] : memref<1x128xf32, #tpu.memory_space<vmem>>, vector<1x128xf32>
    %c0_23 = arith.constant 0 : index
    %c0_24 = arith.constant 0 : index
    %41 = vector.load %arg9[%c0_23, %c0_24] : memref<1x128xf32, #tpu.memory_space<vmem>>, vector<1x128xf32>
    %cst_25 = arith.constant dense<0.000000e+00> : vector<16xf32>
    %42 = vector.multi_reduction <add>, %39, %cst_25 [1] : vector<16x128xf32> to vector<16xf32>
    %43 = vector.shape_cast %42 : vector<16xf32> to vector<16x1xf32>
    %cst_26 = arith.constant 6.250000e-02 : f32
    %44 = vector.broadcast %cst_26 : f32 to vector<16x1xf32>
    %45 = arith.mulf %43, %44 : vector<16x1xf32>
    %46 = arith.mulf %39, %39 : vector<16x128xf32>
    %cst_27 = arith.constant dense<0.000000e+00> : vector<16xf32>
    %47 = vector.multi_reduction <add>, %46, %cst_27 [1] : vector<16x128xf32> to vector<16xf32>
    %48 = vector.shape_cast %47 : vector<16xf32> to vector<16x1xf32>
    %cst_28 = arith.constant 6.250000e-02 : f32
    %49 = vector.broadcast %cst_28 : f32 to vector<16x1xf32>
    %50 = arith.mulf %48, %49 : vector<16x1xf32>
    %51 = arith.mulf %45, %45 : vector<16x1xf32>
    %52 = arith.subf %50, %51 : vector<16x1xf32>
    %cst_29 = arith.constant 0.000000e+00 : f32
    %53 = vector.broadcast %cst_29 : f32 to vector<16x1xf32>
    %54 = arith.maximumf %52, %53 : vector<16x1xf32>
    %55 = vector.broadcast %45 : vector<16x1xf32> to vector<16x128xf32>
    %56 = arith.subf %39, %55 : vector<16x128xf32>
    %cst_30 = arith.constant 9.99999974E-6 : f32
    %57 = vector.broadcast %cst_30 : f32 to vector<16x1xf32>
    %58 = arith.addf %54, %57 : vector<16x1xf32>
    %59 = math.rsqrt %58 : vector<16x1xf32>
    %60 = vector.broadcast %59 : vector<16x1xf32> to vector<16x128xf32>
    %61 = arith.mulf %56, %60 : vector<16x128xf32>
    %62 = vector.broadcast %40 : vector<1x128xf32> to vector<16x128xf32>
    %63 = arith.mulf %61, %62 : vector<16x128xf32>
    %64 = vector.broadcast %41 : vector<1x128xf32> to vector<16x128xf32>
    %65 = arith.addf %63, %64 : vector<16x128xf32>
    %cst_31 = arith.constant 0.000000e+00 : f32
    %66 = vector.broadcast %cst_31 : f32 to vector<16x128xf32>
    %67 = arith.maximumf %65, %66 : vector<16x128xf32>
    %68 = arith.truncf %67 : vector<16x128xf32> to vector<16x128xbf16>
    %c0_32 = arith.constant 0 : index
    %c0_33 = arith.constant 0 : index
    %69 = vector.load %arg10[%c0_32, %c0_33] : memref<128x128xbf16, #tpu.memory_space<vmem>>, vector<128x128xbf16>
    %cst_34 = arith.constant dense<0.000000e+00> : vector<16x128xf32>
    %70 = tpu.matmul %68, %69, %cst_34 {dimension_numbers = #tpu.dot_dimension_numbers<[1], [0], [0], [1], [0, 0, 1, 1], [], []>} : vector<16x128xbf16>, vector<128x128xbf16>, vector<16x128xf32> -> vector<16x128xf32>
    %c0_35 = arith.constant 0 : index
    %c0_36 = arith.constant 0 : index
    %71 = vector.load %arg11[%c0_35, %c0_36] : memref<1x128xf32, #tpu.memory_space<vmem>>, vector<1x128xf32>
    %72 = vector.broadcast %71 : vector<1x128xf32> to vector<16x128xf32>
    %73 = arith.addf %70, %72 : vector<16x128xf32>
    %74 = arith.truncf %73 : vector<16x128xf32> to vector<16x128xbf16>
    %c0_37 = arith.constant 0 : index
    %c0_38 = arith.constant 0 : index
    %75 = vector.load %arg12[%c0_37, %c0_38] : memref<16x128xbf16, #tpu.memory_space<vmem>>, vector<16x128xbf16>
    tpu.vector_store %arg12[%c0_37, %c0_38], %74 {strides = array<i32>} : memref<16x128xbf16, #tpu.memory_space<vmem>>, vector<16x128xbf16>,
    return
  }
  func.func @transform_0(%arg0: i32) -> (i32, i32) {
    %c0_i32 = arith.constant 0 : i32
    %c0_i32_0 = arith.constant 0 : i32
    return %arg0, %c0_i32 : i32, i32
  }
  func.func @transform_1(%arg0: i32) -> (i32, i32) {
    %c0_i32 = arith.constant 0 : i32
    %c0_i32_0 = arith.constant 0 : i32
    %c0_i32_1 = arith.constant 0 : i32
    return %c0_i32, %c0_i32_0 : i32, i32
  }
  func.func @transform_2(%arg0: i32) -> (i32, i32) {
    %c0_i32 = arith.constant 0 : i32
    %c0_i32_0 = arith.constant 0 : i32
    %c0_i32_1 = arith.constant 0 : i32
    return %c0_i32, %c0_i32_0 : i32, i32
  }
  func.func @transform_3(%arg0: i32) -> (i32, i32) {
    %c0_i32 = arith.constant 0 : i32
    %c0_i32_0 = arith.constant 0 : i32
    %c0_i32_1 = arith.constant 0 : i32
    return %c0_i32, %c0_i32_0 : i32, i32
  }
  func.func @transform_4(%arg0: i32) -> (i32, i32) {
    %c0_i32 = arith.constant 0 : i32
    %c0_i32_0 = arith.constant 0 : i32
    %c0_i32_1 = arith.constant 0 : i32
    return %c0_i32, %c0_i32_0 : i32, i32
  }
  func.func @transform_5(%arg0: i32) -> (i32, i32) {
    %c0_i32 = arith.constant 0 : i32
    %c0_i32_0 = arith.constant 0 : i32
    %c0_i32_1 = arith.constant 0 : i32
    return %c0_i32, %c0_i32_0 : i32, i32
  }
  func.func @transform_6(%arg0: i32) -> (i32, i32) {
    %c0_i32 = arith.constant 0 : i32
    %c0_i32_0 = arith.constant 0 : i32
    %c0_i32_1 = arith.constant 0 : i32
    return %c0_i32, %c0_i32_0 : i32, i32
  }
  func.func @transform_7(%arg0: i32) -> (i32, i32) {
    %c0_i32 = arith.constant 0 : i32
    %c0_i32_0 = arith.constant 0 : i32
    %c0_i32_1 = arith.constant 0 : i32
    return %c0_i32, %c0_i32_0 : i32, i32
  }
  func.func @transform_8(%arg0: i32) -> (i32, i32) {
    %c0_i32 = arith.constant 0 : i32
    %c0_i32_0 = arith.constant 0 : i32
    %c0_i32_1 = arith.constant 0 : i32
    return %c0_i32, %c0_i32_0 : i32, i32
  }
  func.func @transform_9(%arg0: i32) -> (i32, i32) {
    %c0_i32 = arith.constant 0 : i32
    %c0_i32_0 = arith.constant 0 : i32
    %c0_i32_1 = arith.constant 0 : i32
    return %c0_i32, %c0_i32_0 : i32, i32
  }
  func.func @transform_10(%arg0: i32) -> (i32, i32) {
    %c0_i32 = arith.constant 0 : i32
    %c0_i32_0 = arith.constant 0 : i32
    %c0_i32_1 = arith.constant 0 : i32
    return %c0_i32, %c0_i32_0 : i32, i32
  }
  func.func @transform_11(%arg0: i32) -> (i32, i32) {
    %c0_i32 = arith.constant 0 : i32
    %c0_i32_0 = arith.constant 0 : i32
    return %arg0, %c0_i32 : i32, i32
  }
}

</mosaic_0001>

<bundles_post_ra>
// kernel: tpu_custom_call.1
= control target key start
LH: loop header
LB: loop body
LE: loop exit
PB: predicated region body
PF: predicated region fallthrough
CT: control target
= control target key end

     0   :  { %s1628_s0 = inlined_call_operand.hbm [shape: bf16[32,64], index: 0, kind: input, shape index: {}]   ;;  %s1629_s1 = inlined_call_operand.hbm [shape: bf16[64,128], index: 1, kind: input, shape index: {}]   ;;  %s1630_s2 = inlined_call_operand.vmem [shape: f32[1,128], index: 2, kind: input, shape index: {}]   ;;  %s1631_s3 = inlined_call_operand.vmem [shape: f32[1,128], index: 3, kind: input, shape index: {}]   ;;  %s1632_s4 = inlined_call_operand.vmem [shape: f32[1,128], index: 4, kind: input, shape index: {}]   ;;  %s1633_s5 = inlined_call_operand.hbm [shape: bf16[128,128], index: 5, kind: input, shape index: {}]   ;;  %s1634_s6 = inlined_call_operand.vmem [shape: f32[1,128], index: 6, kind: input, shape index: {}]   ;;  %s1635_s7 = inlined_call_operand.vmem [shape: f32[1,128], index: 7, kind: input, shape index: {}]   ;;  %s1636_s8 = inlined_call_operand.vmem [shape: f32[1,128], index: 8, kind: input, shape index: {}]   ;;  %s1637_s9 = inlined_call_operand.hbm [shape: bf16[128,128], index: 9, kind: input, shape index: {}]   ;;  %s1638_s10 = inlined_call_operand.vmem [shape: f32[1,128], index: 10, kind: input, shape index: {}]   ;;  %s1639_s11 = inlined_call_operand.hbm [shape: bf16[32,128], index: 11, kind: output, shape index: {}]  }
   0x1   :  { %1643 = sst [smem:[#allocation17_spill]] %s1629_s1 }
   0x2   :  { %1644 = sst [smem:[#allocation18_spill]] %s1633_s5 }
   0x3   :  { %1645 = sst [smem:[#allocation19_spill]] %s1637_s9 }
   0x4   :  { %16 = vsyncpa [#allocation3], 0 }
   0x5   :  { %18 = vsyncpa [#allocation3 + $0x1], 0 }
   0x6   :  { %19 = vsyncpa [#allocation6], 0 }
   0x7   :  { %20 = vsyncpa [#allocation9], 0 }
   0x8   :  { %21 = vsyncpa [#allocation4], 0 }
   0x9   :  { %23 = vsyncpa [#allocation4 + $0x1], 0  ;;  %s1421_s17 = smov 0   ;;  %s1423_s18 = smov 0  }
   0xa   :  { %s1425_s19 = smov 0   ;;  %s1427_s20 = smov 0  }
   0xb LB: > { %1646 = sst [smem:[#allocation15_spill]] %s1348_s19  ;;  %s1442_s21 = sadd.s32 4294967295, %s1352_s20   ;;  %s1352_s20 = sphi %s1427_s20, %s1664_s20   ;;  %s1348_s19 = sphi %s1425_s19, %s1661_s19   ;;  %s1344_s18 = sphi %s1423_s18, %s1663_s18   ;;  %s1340_s17 = sphi %s1421_s17, %s1662_s17  }
   0xc   : > { %s929_s22 = sadd.s32 4294967294, %s1352_s20   ;;  %p49_p0 = scmp.ne.s32.totalorder %s1344_s18, %s1340_s17 }
   0xd   : > { %p50_p1 = scmp.eq.s32.totalorder %s1442_s21, 0  ;;  %p283_p2 = scmp.eq.s32.totalorder %s1442_s21, 1 }
   0xe   : > { %p289_p3 = scmp.eq.s32.totalorder %s929_s22, 1  ;;  %p930_p5 = scmp.ge.s32.totalorder %s1352_s20, 1 }
   0xf   : > { %p1451_p4 = por %p50_p1, %p49_p0  ;;  %p296_p7 = scmp.lt.s32.totalorder %s1352_s20, 3 }
  0x10   : > { %p1456_p6 = por %p289_p3, %p49_p0  ;;  %s1649_s1 = sld [smem:[#allocation17_spill]] }
  0x11   : > { %p1464_p8 = pnand %p930_p5, %p296_p7  ;;  %s1354_s29 = smov [#allocation5]  }
  0x12   : > { %s309_s30 = sshll.u32 %s1354_s29, 4  ;;  %s1652_s5 = sld [smem:[#allocation18_spill]]  ;;  %s310_s30 = int_to_ptr.vmem [resolvable:$true] %s309_s30 }
  0x13   : > { %p1078_p9 = pneg %p1464_p8  ;;  %s1640_s16 = smov 64  }
  0x14   : > { %s1641_s22 = smov 4   ;;  %s1357_s25 = smov [#allocation7]  }
  0x15   : > { %p1472_p10 = pnand %p1078_p9, %p50_p1  ;;  %s332_s26 = sshll.u32 %s1357_s25, 4  ;;  %s333_s26 = int_to_ptr.vmem [resolvable:$true] %s332_s26 }
  0x16   : > { %s307_s27 = sshll.u32 %s1649_s1, 4  ;;  %s1653_s9 = sld [smem:[#allocation19_spill]]  ;;  %s308_s27 = int_to_ptr.hbm [resolvable:$true] %s307_s27 }
  0x17   : > { %1081 = dma.hbm_to_vmem [thread:$0]  (!%p1472_p10), %s308_s27, 512, %s310_s30, [#allocation6], %s1640_s16, %s1640_s16, %s1641_s22  }
  0x18   : > { %s330_s15 = sshll.u32 %s1652_s5, 4  ;;  %s1358_s27 = smov [#allocation8]   ;;  %s331_s15 = int_to_ptr.hbm [resolvable:$true] %s330_s15 }
  0x19   : > { %1084 = dma.hbm_to_vmem [thread:$0]  (!%p1472_p10), %s331_s15, 1024, %s333_s26, [#allocation6], %s1640_s16, %s1640_s16, %s1641_s22  }
  0x1a   : > { %s355_s30 = sshll.u32 %s1358_s27, 4  ;;  %s1494_s1 = sadd.s32 1, %s1352_s20   ;;  %s356_s30 = int_to_ptr.vmem [resolvable:$true] %s355_s30 }
  0x1b   : > { %s33_s25 = ssub.s32 %s1352_s20, %s1494_s1  ;;  %s36_s29 = sadd.s32 1, %s1348_s19 }
  0x1c   : > { %s353_s14 = sshll.u32 %s1653_s9, 4  ;;  %p34_p12 = scmp.eq.s32.totalorder %s33_s25, 0  ;;  %s354_s14 = int_to_ptr.hbm [resolvable:$true] %s353_s14 }
  0x1d   : > { %1087 = dma.hbm_to_vmem [thread:$0]  (!%p1472_p10), %s354_s14, 1024, %s356_s30, [#allocation9], %s1640_s16, %s1640_s16, %s1641_s22  }
  0x1e   : > { %p43_p13 = scmp.ne.s32.totalorder %s1348_s19, %s1344_s18  ;;  %p44_p0 = scmp.eq.s32.totalorder %s1352_s20, 0 }
  0x1f   : > { %s1508_s13 = scalar_select %p34_p12, %s1348_s19, %s36_s29  }
  0x20   : > { %p1512_p3 = por %p283_p2, %p43_p13  ;;  %p1099_p5 = scmp.lt.s32.totalorder %s1352_s20, 2 }
  0x21   : > { %1654 = sst [smem:[#allocation16_spill]] %s1508_s13  ;;  %s372_s26 = sand.u32 1, %s1348_s19  }
  0x22   : > { %s1034_s12 = sshll.u32 %s1352_s20, 3  ;;  %p45_p7 = por %p44_p0, %p43_p13 }
  0x23   : > { %s935_s27 = sshll.u32 %s372_s26, 3  ;;  %s381_s14 = scalar_lea.hbm %s1628_s0, %s1034_s12 }
  0x24   : > { %s382_s30 = sshll.u32 %s381_s14, 4  ;;  %s376_s25 = scalar_lea.vmem [#allocation2], %s935_s27  ;;  %s383_s30 = int_to_ptr.hbm [resolvable:$true] %s382_s30 }
  0x25   : > { %s384_s16 = sshll.u32 %s376_s25, 4  ;;  %p1522_p9 = pnand %p1099_p5, %p45_p7  ;;  %s385_s16 = int_to_ptr.vmem [resolvable:$true] %s384_s16 }
  0x26   : > { %s373_s22 = scalar_lea.sflag [#allocation3], %s372_s26  ;;  %s1248_s13 = sshra.s32 %s383_s30, 4  ;;  %s1249_s13 = int_to_ptr.hbm [resolvable:$true] %s1248_s13 }
  0x27   : > { %s1250_s19 = scalar_lea.hbm %s1249_s13, 8  ;;  %p1252_p10 = pneg %p1522_p9 }
  0x28   : > { %p1251_p2 = scmp.ne.s32.totalorder %s1249_s13, %s1250_s19  ;;  %s1255_s12 = scalar_lea.hbm %s1628_s0, 16 }
  0x29   : > { %p1256_p0 = scmp.lt.s32.totalorder %s1249_s13, %s1628_s0  ;;  %p1257_p5 = scmp.lt.s32.totalorder %s1255_s12, %s1250_s19 }
  0x2a   : > { %p1253_p12 = pnand %p1252_p10, %p1251_p2 }
  0x2b   : > { %p1258_p7 = por %p1257_p5, %p1256_p0 }
  0x2c   : > { %p1254_p13 = pneg %p1253_p12 }
  0x2e   : > { %p1259_p11 = pnand %p1258_p7, %p1254_p13 }
  0x30   : > { %1262 = shalt.err (!%p1259_p11)
}
  0x31   : > { %s1657_s26 = smov 4   ;;  %s1658_s25 = smov 64  }
  0x32   : > { %1091 = dma.hbm_to_vmem [thread:$0]  (!%p1522_p9), %s383_s30, 128, %s385_s16, %s373_s22, %s1658_s25, %s1658_s25, %s1657_s26  }
  0x33   : > { %396 = sbr.rel (%p1464_p8) target bundleno = 805 (0x325), region = 64  ;;  %s1542_s5 = sand.u32 (!%p1464_p8), 1, %s1344_s18  }
  0x34   : > { %s939_s19 = sshll.u32 (!%p1464_p8), %s1542_s5, 3  ;;  %s399_s13 = scalar_lea.sflag (!%p1464_p8), [#allocation3], %s1542_s5 }
  0x35   : > { %s402_s9 = scalar_lea.vmem (!%p1464_p8), [#allocation2], %s939_s19 }
  0x38   : > { %1323 = dma.done.wait (%p1451_p4), %s399_s13, 128  }
  0x39   : > { %1325 = vsyncadd (%p1451_p4), %s399_s13, 4294967168 }
  0x3a   : > { %1327 = dma.done.wait (%p50_p1), [#allocation6], 1536  }
  0x3b   : > { %1329 = vsyncadd (%p50_p1), [#allocation6], 4294965760 }
  0x3c   : > { %1331 = dma.done.wait (%p50_p1), [#allocation9], 1024  }
  0x3d   : > { %1333 = vsyncadd (%p50_p1), [#allocation9], 4294966272  ;;  %v1039_v0 = vld [vmem:[#allocation5 + $0x18] sm:$0xff]  ;;  %v1038_v1 = vld [vmem:[#allocation5 + $0x10] sm:$0xff]  ;;  %vm503_vm0 = vcmask 523264   ;;  %s456_s29 = scalar_lea.vmem [#allocation10], %s939_s19 }
  0x3e   : > { %511 = vmatpush.bf16.msra.mxu0 %v1039_v0  ;;  %v1037_v2 = vld [vmem:[#allocation5 + $0x8] sm:$0xff]  ;;  %v1036_v3 = vld [vmem:[#allocation5] sm:$0xff]  ;;  %v1035_v4 = vld [vmem:[%s402_s9] sm:$0xff]  ;;  %s1056_s9 = sshll.u32 %s1442_s21, 3  ;;  %s824_s12 = sshll.u32 %s456_s29, 4  ;;  %s825_s12 = int_to_ptr.vmem [resolvable:$true] %s824_s12 }
  0x3f   : > { %v1143_v5 = vld [vmem:[%s1630_s2] ss:$0 sm:$0xff]  ;;  %v1047_v12 = vld [vmem:[#allocation7 + $0x38] sm:$0xff]  ;;  %v1045_v14 = vld [vmem:[#allocation7 + $0x28] sm:$0xff]  ;;  %s823_s16 = scalar_lea.hbm %s1639_s11, %s1056_s9  ;;  %s812_s21 = scalar_lea.sflag [#allocation4], %s1542_s5 }
  0x40   : > { %650 = vmatpush.bf16.msra.mxu1 %v1047_v12  ;;  %v1046_v13 = vld [vmem:[#allocation7 + $0x30] sm:$0xff]  ;;  %v1044_v15 = vld [vmem:[#allocation7 + $0x20] sm:$0xff]  ;;  %v1043_v16 = vld [vmem:[#allocation7 + $0x18] sm:$0xff]  ;;  %s826_s27 = sshll.u32 %s823_s16, 4  ;;  %s1298_s19 = scalar_lea.hbm %s1639_s11, 16  ;;  %s827_s27 = int_to_ptr.hbm [resolvable:$true] %s826_s27 }
  0x41   : > { %v1042_v22 = vld [vmem:[#allocation7 + $0x10] sm:$0xff]  ;;  %v1041_v24 = vld [vmem:[#allocation7 + $0x8] sm:$0xff]  ;;  %v1040_v29 = vld [vmem:[#allocation7] sm:$0xff]  ;;  %s1292_s14 = sshra.s32 %s827_s27, 4  ;;  %s1293_s14 = int_to_ptr.hbm [resolvable:$true] %s1292_s14 }
  0x42   : > { %512 = vmatpush.bf16.msra.mxu0 %v1038_v1  ;;  %v1144_v49 = vld [vmem:[%s1631_s3] ss:$0 sm:$0xff]  ;;  %s1294_s26 = scalar_lea.hbm %s1293_s14, 8  ;;  %p1299_p11 = scmp.lt.s32.totalorder %s1293_s14, %s1639_s11 }
  0x43   : > { %v1145_v54 = vld [vmem:[%s1632_s4] ss:$0 sm:$0xff]  ;;  %p1295_p1 = scmp.ne.s32.totalorder %s1293_s14, %s1294_s26  ;;  %p1300_p9 = scmp.lt.s32.totalorder %s1298_s19, %s1294_s26 }
  0x44   : > { %651 = vmatpush.bf16.msra.mxu1 %v1046_v13  ;;  %v1146_v63 = vld [vmem:[%s1634_s6] ss:$0 sm:$0xff] }
  0x45   : > { %p1296_p4 = pnand %p1295_p1, %p1512_p3  ;;  %p1301_p2 = por %p1300_p9, %p1299_p11 }
  0x46   : > { %513 = vmatpush.bf16.msra.mxu0 %v1037_v2 }
  0x47   : > { %p1297_p8 = pneg %p1296_p4 }
  0x48   : > { %652 = vmatpush.bf16.msra.mxu1 %v1045_v14 }
  0x49   : > { %p1302_p10 = pnand %p1301_p2, %p1297_p8 }
  0x4a   : > { %514 = vmatpush.bf16.msra.mxu0 %v1036_v3 }
  0x4c   : > { %653 = vmatpush.bf16.msra.mxu1 %v1044_v15 }
  0x4d   : > { %964 = vmatmul.msk.bf16.vlgmr.msra.gmra.mxu0 %vm503_vm0, %v1035_v4 }
  0x50   : > { %654 = vmatpush.bf16.msra.mxu1 %v1043_v16  ;;  %v1050_v16 = vld [vmem:[#allocation8 + $0x10] sm:$0xff] }
  0x54   : > { %655 = vmatpush.bf16.msra.mxu1 %v1042_v22 }
  0x58   : > { %656 = vmatpush.bf16.msra.mxu1 %v1041_v24 }
  0x5c   : > { %657 = vmatpush.bf16.msra.mxu1 %v1040_v29 }
  0xca   : > { %v516_v6 = vpop.f32.mrf.mxu0 }
  0xcb   : > { %v517_v7 = vadd.f32 %v1143_v5, %v516_v6  ;;  %v1055_v6 = vld [vmem:[#allocation8 + $0x38] sm:$0xff] }
  0xcc   : > { %793 = vmatpush.bf16.msra.mxu2 %v1055_v6 }
  0xcd   : > { %523 = vadd.xlane.f32.xlu0 %v517_v7  ;;  %v529_v8 = vmul.f32 %v517_v7, %v517_v7 }
  0xcf   : > { %531 = vadd.xlane.f32.xlu1 %v529_v8  ;;  %v1053_v8 = vld [vmem:[#allocation8 + $0x28] sm:$0xff] }
  0xd2   : > { %v518_v9 = vpop.f32.mrf.mxu0 }
  0xd3   : > { %v1563_v10 = vadd.f32 %v1143_v5, %v518_v9  ;;  %v1052_v9 = vld [vmem:[#allocation8 + $0x20] sm:$0xff] }
  0xd5   : > { %525 = vadd.xlane.f32.xlu0 %v1563_v10  ;;  %v530_v11 = vmul.f32 %v1563_v10, %v1563_v10 }
  0xd7   : > { %533 = vadd.xlane.f32.xlu1 %v530_v11 }
 0x140   : > { %v524_v17 = vpop.xlane.xlu0 %523 }
 0x141   : > { %v527_v18 = vmul.f32 0.03125, %v524_v17 }
 0x142   : > { %v532_v19 = vpop.xlane.xlu1 %531 }
 0x143   : > { %v537_v20 = vmul.f32 %v527_v18, %v527_v18  ;;  %v535_v21 = vmul.f32 0.03125, %v532_v19  ;;  %v543_v46 = vsub.f32 %v517_v7, %v527_v18  ;;  %v1054_v7 = vld [vmem:[#allocation8 + $0x30] sm:$0xff]  ;;  %v1049_v18 = vld [vmem:[#allocation8 + $0x8] sm:$0xff] }
 0x144   : > { %794 = vmatpush.bf16.msra.mxu2 %v1054_v7 }
 0x145   : > { %v539_v23 = vsub.f32 %v535_v21, %v537_v20 }
 0x147   : > { %v541_v25 = vmax.f32 %v539_v23, 0.0  ;;  %v1048_v23 = vld [vmem:[#allocation8] sm:$0xff] }
 0x148   : > { %v526_v26 = vpop.xlane.xlu0 %525  ;;  %795 = vmatpush.bf16.msra.mxu2 %v1053_v8 }
 0x149   : > { %v545_v27 = vadd.f32 1e-05, %v541_v25  ;;  %v528_v28 = vmul.f32 0.03125, %v526_v26 }
 0x14a   : > { %v534_v30 = vpop.xlane.xlu1 %533 }
 0x14b   : > { %1150 = vrsqrt.f32 %v545_v27  ;;  %v538_v31 = vmul.f32 %v528_v28, %v528_v28  ;;  %v536_v32 = vmul.f32 0.03125, %v534_v30  ;;  %vm553_vm2 = vweird.f32 %v545_v27 }
 0x14c   : > { %v544_v52 = vsub.f32 %v1563_v10, %v528_v28  ;;  %796 = vmatpush.bf16.msra.mxu2 %v1052_v9  ;;  %v1051_v10 = vld [vmem:[#allocation8 + $0x18] sm:$0xff] }
 0x14d   : > { %v540_v33 = vsub.f32 %v536_v32, %v538_v31 }
 0x14f   : > { %v542_v34 = vmax.f32 %v540_v33, 0.0 }
 0x150   : > { %797 = vmatpush.bf16.msra.mxu2 %v1051_v10 }
 0x151   : > { %v1151_v35 = vpop.eup %1150  ;;  %v546_v37 = vadd.f32 1e-05, %v542_v34 }
 0x152   : > { %v548_v36 = vmul.f32 %v1151_v35, %v545_v27  ;;  %vm554_vm1 = vweird.f32 %v1151_v35 }
 0x153   : > { %1152 = vrsqrt.f32 %v546_v37  ;;  %vm555_vm3 = vmor %vm553_vm2, %vm554_vm1  ;;  %vm563_vm5 = vweird.f32 %v546_v37 }
 0x154   : > { %v549_v38 = vmul.f32 %v1151_v35, %v548_v36  ;;  %798 = vmatpush.bf16.msra.mxu2 %v1050_v16 }
 0x156   : > { %v550_v39 = vmul.f32 0.5, %v549_v38 }
 0x158   : > { %v551_v40 = vsub.f32 1.5, %v550_v39  ;;  %799 = vmatpush.bf16.msra.mxu2 %v1049_v18 }
 0x159   : > { %v1153_v41 = vpop.eup %1152 }
 0x15a   : > { %v552_v42 = vmul.f32 %v1151_v35, %v551_v40  ;;  %v558_v43 = vmul.f32 %v1153_v41, %v546_v37  ;;  %vm564_vm4 = vweird.f32 %v1153_v41 }
 0x15b   : > { %vm565_vm6 = vmor %vm563_vm5, %vm564_vm4 }
 0x15c   : > { %v559_v44 = vmul.f32 %v1153_v41, %v558_v43  ;;  %v556_v45 = vsel %vm555_vm3, %v1151_v35, %v552_v42  ;;  %800 = vmatpush.bf16.msra.mxu2 %v1048_v23  ;;  %v1147_v43 = vld [vmem:[%s1635_s7] ss:$0 sm:$0xff] }
 0x15d   : > { %v567_v48 = vmul.f32 %v556_v45, %v543_v46 }
 0x15e   : > { %v560_v47 = vmul.f32 0.5, %v559_v44 }
 0x15f   : > { %v572_v53 = vmul.f32 %v1144_v49, %v567_v48  ;;  %v1148_v48 = vld [vmem:[%s1636_s8] ss:$0 sm:$0xff] }
 0x160   : > { %v561_v50 = vsub.f32 1.5, %v560_v47 }
 0x161   : > { %v577_v58 = vadd.f32 %v1145_v54, %v572_v53 }
 0x162   : > { %v562_v51 = vmul.f32 %v1153_v41, %v561_v50 }
 0x163   : > { %v579_v60 = vmax.f32 %v577_v58, 0.0  ;;  %v1149_v58 = vld [vmem:[%s1638_s10] ss:$0 sm:$0xff] }
 0x164   : > { %v566_v55 = vsel %vm565_vm6, %v1153_v41, %v562_v51 }
 0x165   : > { %v568_v56 = vmul.f32 %v566_v55, %v544_v52 }
 0x167   : > { %v573_v57 = vmul.f32 %v1144_v49, %v568_v56 }
 0x169   : > { %v578_v59 = vadd.f32 %v1145_v54, %v573_v57 }
 0x16b   : > { %v580_v61 = vmax.f32 %v578_v59, 0.0 }
 0x16d   : > { %v581_v62 = vpack.c.bf16 %v580_v61, %v579_v60 }
 0x16f   : > { %658 = vmatmul.bf16.vlgmr.msra.gmra.mxu1 %v581_v62 }
 0x1ec   : > { %v659_v0 = vpop.f32.mrf.mxu1 }
 0x1ed   : > { %v660_v1 = vadd.f32 %v1146_v63, %v659_v0 }
 0x1ef   : > { %666 = vadd.xlane.f32.xlu2 %v660_v1  ;;  %v672_v2 = vmul.f32 %v660_v1, %v660_v1 }
 0x1f1   : > { %674 = vadd.xlane.f32.xlu0 %v672_v2 }
 0x1f4   : > { %v661_v3 = vpop.f32.mrf.mxu1 }
 0x1f5   : > { %v1578_v4 = vadd.f32 %v1146_v63, %v661_v3 }
 0x1f7   : > { %668 = vadd.xlane.f32.xlu2 %v1578_v4  ;;  %v673_v5 = vmul.f32 %v1578_v4, %v1578_v4 }
 0x1f9   : > { %676 = vadd.xlane.f32.xlu1 %v673_v5 }
 0x262   : > { %v667_v11 = vpop.xlane.xlu2 %666 }
 0x263   : > { %v670_v12 = vmul.f32 0.0625, %v667_v11 }
 0x264   : > { %v675_v13 = vpop.xlane.xlu0 %674 }
 0x265   : > { %v680_v14 = vmul.f32 %v670_v12, %v670_v12  ;;  %v678_v15 = vmul.f32 0.0625, %v675_v13  ;;  %v686_v40 = vsub.f32 %v660_v1, %v670_v12 }
 0x267   : > { %v682_v17 = vsub.f32 %v678_v15, %v680_v14 }
 0x269   : > { %v684_v19 = vmax.f32 %v682_v17, 0.0 }
 0x26a   : > { %v669_v20 = vpop.xlane.xlu2 %668 }
 0x26b   : > { %v688_v21 = vadd.f32 1e-05, %v684_v19  ;;  %v671_v22 = vmul.f32 0.0625, %v669_v20 }
 0x26c   : > { %v677_v24 = vpop.xlane.xlu1 %676 }
 0x26d   : > { %1154 = vrsqrt.f32 %v688_v21  ;;  %v681_v25 = vmul.f32 %v671_v22, %v671_v22  ;;  %v679_v26 = vmul.f32 0.0625, %v677_v24  ;;  %vm696_vm8 = vweird.f32 %v688_v21 }
 0x26e   : > { %v687_v46 = vsub.f32 %v1578_v4, %v671_v22 }
 0x26f   : > { %v683_v27 = vsub.f32 %v679_v26, %v681_v25 }
 0x271   : > { %v685_v28 = vmax.f32 %v683_v27, 0.0 }
 0x273   : > { %v1155_v29 = vpop.eup %1154  ;;  %v689_v31 = vadd.f32 1e-05, %v685_v28 }
 0x274   : > { %v691_v30 = vmul.f32 %v1155_v29, %v688_v21  ;;  %vm697_vm7 = vweird.f32 %v1155_v29 }
 0x275   : > { %1156 = vrsqrt.f32 %v689_v31  ;;  %vm698_vm9 = vmor %vm696_vm8, %vm697_vm7  ;;  %vm706_vm11 = vweird.f32 %v689_v31 }
 0x276   : > { %v692_v32 = vmul.f32 %v1155_v29, %v691_v30 }
 0x278   : > { %v693_v33 = vmul.f32 0.5, %v692_v32 }
 0x27a   : > { %v694_v34 = vsub.f32 1.5, %v693_v33 }
 0x27b   : > { %v1157_v35 = vpop.eup %1156 }
 0x27c   : > { %v695_v36 = vmul.f32 %v1155_v29, %v694_v34  ;;  %v701_v37 = vmul.f32 %v1157_v35, %v689_v31  ;;  %vm707_vm10 = vweird.f32 %v1157_v35 }
 0x27d   : > { %vm708_vm12 = vmor %vm706_vm11, %vm707_vm10 }
 0x27e   : > { %v702_v38 = vmul.f32 %v1157_v35, %v701_v37  ;;  %v699_v39 = vsel %vm698_vm9, %v1155_v29, %v695_v36 }
 0x27f   : > { %v710_v42 = vmul.f32 %v699_v39, %v686_v40 }
 0x280   : > { %v703_v41 = vmul.f32 0.5, %v702_v38 }
 0x281   : > { %v715_v47 = vmul.f32 %v1147_v43, %v710_v42 }
 0x282   : > { %v704_v44 = vsub.f32 1.5, %v703_v41 }
 0x283   : > { %v720_v52 = vadd.f32 %v1148_v48, %v715_v47 }
 0x284   : > { %v705_v45 = vmul.f32 %v1157_v35, %v704_v44 }
 0x285   : > { %v722_v54 = vmax.f32 %v720_v52, 0.0 }
 0x286   : > { %v709_v49 = vsel %vm708_vm12, %v1157_v35, %v705_v45 }
 0x287   : > { %v711_v50 = vmul.f32 %v709_v49, %v687_v46 }
 0x289   : > { %v716_v51 = vmul.f32 %v1147_v43, %v711_v50 }
 0x28b   : > { %v721_v53 = vadd.f32 %v1148_v48, %v716_v51 }
 0x28d   : > { %v723_v55 = vmax.f32 %v721_v53, 0.0 }
 0x28f   : > { %v724_v56 = vpack.c.bf16 %v723_v55, %v722_v54 }
 0x291   : > { %801 = vmatmul.bf16.vlgmr.msra.gmra.mxu2 %v724_v56 }
 0x314   : > { %v802_v57 = vpop.f32.mrf.mxu2 }
 0x315   : > { %v803_v60 = vadd.f32 %v1149_v58, %v802_v57 }
 0x31c   : > { %v804_v59 = vpop.f32.mrf.mxu2 }
 0x31d   : > { %v805_v61 = vadd.f32 %v1149_v58, %v804_v59 }
 0x31f   : > { %v1060_v62 = vpack.c.bf16 %v805_v61, %v803_v60 }
 0x321   : > { %1061 = vst [vmem:[%s456_s29] sm:$0xff] %v1060_v62  }
 0x322   : > { %1305 = shalt.err (!%p1302_p10)
}
 0x323   : > { %s1359_s5 = smov 64   ;;  %s1360_s28 = smov 4  }
 0x324   : > { %1076 = dma.vmem_to_hbm [thread:$0]  (%p1512_p3), %s825_s12, 128, %s827_s27, %s812_s21, %s1359_s5, %s1359_s5, %s1360_s28  }
 0x325 PF: > { %s841_s16 = sand.u32 1, %s1340_s17   ;;  %p1659_p12 = scmp.ge.s32.totalorder %s1352_s20, 2 }
 0x326   : > { %s842_s22 = scalar_lea.sflag [#allocation4], %s841_s16 }
 0x327   : > { %p1093_p13 = pnand %p1659_p12, %p1456_p6 }
 0x329   : > { %p1094_p0 = pneg %p1093_p13 }
 0x32b   : > { %1335 = dma.done.wait (%p1094_p0), %s842_s22, 128  }
 0x32c   : > { %1337 = vsyncadd (%p1094_p0), %s842_s22, 4294967168  ;;  %s1660_s30 = sld [smem:[#allocation15_spill]]  ;;  %p26_p5 = scmp.ge.s32.totalorder %s1494_s1, 4  }
 0x32d   : > { %s1661_s19 = sld [smem:[#allocation16_spill]]  ;;  %s1662_s17 = smov %s1344_s18 }
 0x32e   : > { %s1664_s20 = smov %s1494_s1  ;;  %28 = sbr.rel (!%p26_p5) target bundleno = 11 (0xb), region = 121 }
 0x332   : > { %s1663_s18 = smov %s1660_s30 }
 0x333   :  { %848 = vsyncpa [#allocation3], 1 }
 0x334   :  { %850 = vsyncpa [#allocation3 + $0x1], 1 }
 0x335   :  { %851 = vsyncpa [#allocation6], 1 }
 0x336   :  { %852 = vsyncpa [#allocation9], 1 }
 0x337   :  { %853 = vsyncpa [#allocation4], 1 }
 0x338   :  { %855 = vsyncpa [#allocation4 + $0x1], 1 }

</bundles_post_ra>
